<compile_context>
chip_gen: v6e
topology: v6e:2x2x1
jax: 0.10.0
libtpu: 0.0.40
codegen_flags: <defaults>
</compile_context>

<pallas_src>
import jax
import jax.numpy as jnp
from jax.experimental import pallas as pl
from jax.experimental.pallas import tpu as pltpu

_LANE = 128
# Ragged (n % 128 != 0) tensors up to this many raw bytes run as one
# whole-array VMEM block; the (8,128)-padded VMEM footprint stays small.
_SMALL_RAGGED_MAX_BYTES = 512 * 1024


def _h_sigmoid_kernel(x_ref, o_ref):
    # Compute in f32 regardless of storage dtype: matches the reference
    # formula relu6(x+3)/6 for low-precision inputs; cost is hidden (HBM-bound).
    x = x_ref[...].astype(jnp.float32)
    y = jnp.clip(x + 3.0, 0.0, 6.0) / 6.0
    o_ref[...] = y.astype(o_ref.dtype)


def _sublane(dtype) -> int:
    # Packed sublane tile height: 8 for 4-byte, 16 for 2-byte, 32 for 1-byte.
    return max(8, 32 // max(jnp.dtype(dtype).itemsize, 1))


def _chip_hints():
    """(num_tensorcores, target_block_bytes) for the current TPU generation."""
    kind = ""
    try:
        kind = jax.devices()[0].device_kind.lower()
    except Exception:
        pass
    is_v7 = "v7" in kind
    num_tc = 2 if is_v7 else 1
    # v7x HBM (~3.2 TB/s) makes the ~0.35 us per-grid-step overhead relatively
    # more expensive -> bigger blocks; 2 MiB already sits near roofline on
    # v5e/v6e.
    target_block_bytes = (8 << 20) if is_v7 else (2 << 20)
    return num_tc, target_block_bytes


def _cost_estimate(n_elems: int, itemsize: int) -> pl.CostEstimate:
    return pl.CostEstimate(
        flops=3 * n_elems,
        transcendentals=0,
        bytes_accessed=2 * n_elems * itemsize,
    )


def _h_sigmoid_tiled(x2d: jax.Array, *, donate_input: bool = False) -> jax.Array:
    """Tiled streaming path for a lane-dense (rows, 128) slab."""
    rows, lane = x2d.shape
    dtype = x2d.dtype
    itemsize = jnp.dtype(dtype).itemsize
    sub = _sublane(dtype)
    num_tc, target_block_bytes = _chip_hints()

    target_rows = max(sub, (target_block_bytes // (lane * itemsize)) // sub * sub)

    if rows <= target_rows:
        if num_tc >= 2 and rows > sub:
            # Two near-equal blocks so both v7x TensorCores stream.
            tr = ((pl.cdiv(rows, 2) + sub - 1) // sub) * sub
            tr = min(tr, rows)
        else:
            # Single full block on single-TC chips (v5e/v6e): no extra grid
            # step or pipeline fill/drain for small activations.
            tr = rows
    else:
        nblk = pl.cdiv(rows, target_rows)
        if num_tc >= 2 and nblk % num_tc != 0:
            # Even block count -> balanced contiguous halves across 2 TCs.
            nblk += num_tc - (nblk % num_tc)
        tr = ((pl.cdiv(rows, nblk) + sub - 1) // sub) * sub
        tr = max(sub, min(tr, target_rows))

    grid = (pl.cdiv(rows, tr),)  # partial last block is fine

    block_bytes = tr * lane * itemsize
    # 2 arrays x 2 pipeline buffers x block, plus slack, capped under v7x's
    # 64 MiB per-TC VMEM.
    vmem_limit = int(min(64 << 20, max(16 << 20, 4 * block_bytes + (8 << 20))))

    extra = {}
    if donate_input:
        # Write the result into the input's HBM buffer (caller must not reuse x).
        extra["input_output_aliases"] = {0: 0}

    return pl.pallas_call(
        _h_sigmoid_kernel,
        out_shape=jax.ShapeDtypeStruct((rows, lane), dtype),
        grid_spec=pltpu.PrefetchScalarGridSpec(
            num_scalar_prefetch=0,
            grid=grid,
            in_specs=[pl.BlockSpec((tr, lane), lambda i: (i, 0))],
            out_specs=pl.BlockSpec((tr, lane), lambda i: (i, 0)),
        ),
        compiler_params=pltpu.CompilerParams(
            dimension_semantics=("parallel",),
            vmem_limit_bytes=vmem_limit,
        ),
        cost_estimate=_cost_estimate(rows * lane, itemsize),
        **extra,
    )(x2d)


def _h_sigmoid_whole(flat: jax.Array) -> jax.Array:
    """Single whole-array VMEM block for small ragged element counts."""
    n = flat.shape[0]
    itemsize = jnp.dtype(flat.dtype).itemsize
    x2d = flat.reshape(1, n)  # lane-major; full-dim block, no (8,128) constraint
    out = pl.pallas_call(
        _h_sigmoid_kernel,
        out_shape=jax.ShapeDtypeStruct((1, n), flat.dtype),
        compiler_params=pltpu.CompilerParams(vmem_limit_bytes=32 << 20),
        cost_estimate=_cost_estimate(n, itemsize),
    )(x2d)
    return out.reshape(n)


def h_sigmoid(x: jax.Array, *, donate_input: bool = False) -> jax.Array:
    """h_sigmoid(x) = relu6(x + 3) / 6, elementwise, any shape (NCHW expected)."""
    if not jnp.issubdtype(x.dtype, jnp.floating):
        raise TypeError(f"h_sigmoid expects a floating dtype, got {x.dtype}")

    shape, dtype = x.shape, x.dtype
    n = x.size
    if n == 0:
        return x

    flat = x.reshape(-1)

    if n % _LANE == 0:
        # Zero-copy lane-dense slab; Pallas masks a partial last row-block, so
        # no pad/slice HBM round-trips even when n % (sub*128) != 0.
        out2d = _h_sigmoid_tiled(
            flat.reshape(n // _LANE, _LANE), donate_input=donate_input
        )
        return out2d.reshape(shape)

    if n * jnp.dtype(dtype).itemsize <= _SMALL_RAGGED_MAX_BYTES:
        # Small ragged tensor: one whole-array VMEM block, still zero-copy.
        return _h_sigmoid_whole(flat).reshape(shape)

    # Large ragged tensor (rare): tile the 128-aligned prefix, finish the
    # <128-element tail with a tiny jnp expression.
    # TODO(synk): the prefix slice + concatenate still cost one extra HBM pass;
    # an overlapping Element-indexed final block could remove it.
    n_main = (n // _LANE) * _LANE
    out_main = _h_sigmoid_tiled(flat[:n_main].reshape(n_main // _LANE, _LANE))
    tail = flat[n_main:].astype(jnp.float32)
    out_tail = (jnp.clip(tail + 3.0, 0.0, 6.0) / 6.0).astype(dtype)
    return jnp.concatenate([out_main.reshape(-1), out_tail]).reshape(shape)


def h_sigmoid_ref(x: jax.Array) -> jax.Array:
    xf = x.astype(jnp.float32)
    return (jnp.clip(xf + 3.0, 0.0, 6.0) / 6.0).astype(x.dtype)


if __name__ == "__main__":
    key = jax.random.PRNGKey(0)
    k1, k2, k3 = jax.random.split(key, 3)

    # NCHW input, 128-aligned element count (2*4*16*16 = 2048) -> tiled path.
    x = jax.random.normal(k1, (2, 4, 16, 16), dtype=jnp.float32) * 4.0
    y = jax.block_until_ready(h_sigmoid(x))
    assert y.shape == x.shape and y.dtype == x.dtype
    assert jnp.allclose(y, h_sigmoid_ref(x), atol=1e-6, rtol=1e-6)

    # Ragged element count (2*3*7*5 = 210) -> whole-array single-block path.
    x2 = jax.random.normal(k2, (2, 3, 7, 5), dtype=jnp.float32) * 4.0
    y2 = jax.block_until_ready(h_sigmoid(x2))
    assert y2.shape == x2.shape and y2.dtype == x2.dtype
    assert jnp.allclose(y2, h_sigmoid_ref(x2), atol=1e-6, rtol=1e-6)

    # bf16 storage: kernel upcasts to f32 internally, casts back on store.
    x3 = (jax.random.normal(k3, (2, 4, 16, 16), dtype=jnp.float32) * 4.0).astype(
        jnp.bfloat16
    )
    y3 = jax.block_until_ready(h_sigmoid(x3))
    assert y3.shape == x3.shape and y3.dtype == x3.dtype
    assert jnp.allclose(
        y3.astype(jnp.float32), h_sigmoid_ref(x3).astype(jnp.float32),
        atol=4e-3, rtol=0.0,
    )

    print("KERNEL_OK")
</pallas_src>

<mosaic_0001>
module attributes {stable_mosaic.version = 11 : i64} {
  func.func @_h_sigmoid_kernel(%arg0: i32, %arg1: memref<16x128xf32, #tpu.memory_space<vmem>>, %arg2: memref<16x128xf32, #tpu.memory_space<vmem>>) attributes {dimension_semantics = [#tpu.dimension_semantics<parallel>], iteration_bounds = array<i64: 1>, scalar_prefetch = 0 : i64, scratch_operands = 0 : i64, tpu.core_type = #tpu.core_type<tc>, window_params = [{transform_indices = @transform_0, window_bounds = array<i64: 16, 128>}, {transform_indices = @transform_1, window_bounds = array<i64: 16, 128>}]} {
    %c0 = arith.constant 0 : index
    %c0_0 = arith.constant 0 : index
    %0 = vector.load %arg1[%c0, %c0_0] : memref<16x128xf32, #tpu.memory_space<vmem>>, vector<16x128xf32>
    %cst = arith.constant 3.000000e+00 : f32
    %1 = vector.broadcast %cst : f32 to vector<16x128xf32>
    %2 = arith.addf %0, %1 : vector<16x128xf32>
    %cst_1 = arith.constant 0.000000e+00 : f32
    %cst_2 = arith.constant 6.000000e+00 : f32
    %3 = vector.broadcast %cst_1 : f32 to vector<16x128xf32>
    %4 = arith.maximumf %3, %2 : vector<16x128xf32>
    %5 = vector.broadcast %cst_2 : f32 to vector<16x128xf32>
    %6 = arith.minimumf %5, %4 : vector<16x128xf32>
    %cst_3 = arith.constant 6.000000e+00 : f32
    %7 = vector.broadcast %cst_3 : f32 to vector<16x128xf32>
    %8 = arith.divf %6, %7 : vector<16x128xf32>
    %c0_4 = arith.constant 0 : index
    %c0_5 = arith.constant 0 : index
    %9 = vector.load %arg2[%c0_4, %c0_5] : memref<16x128xf32, #tpu.memory_space<vmem>>, vector<16x128xf32>
    tpu.vector_store %arg2[%c0_4, %c0_5], %8 {strides = array<i32>} : memref<16x128xf32, #tpu.memory_space<vmem>>, vector<16x128xf32>,
    return
  }
  func.func @transform_0(%arg0: i32) -> (i32, i32) {
    %c0_i32 = arith.constant 0 : i32
    %c0_i32_0 = arith.constant 0 : i32
    return %arg0, %c0_i32 : i32, i32
  }
  func.func @transform_1(%arg0: i32) -> (i32, i32) {
    %c0_i32 = arith.constant 0 : i32
    %c0_i32_0 = arith.constant 0 : i32
    return %arg0, %c0_i32 : i32, i32
  }
}

</mosaic_0001>

<bundles_post_ra>
// kernel: tpu_custom_call.1
= control target key start
LH: loop header
LB: loop body
LE: loop exit
PB: predicated region body
PF: predicated region fallthrough
CT: control target
= control target key end

     0   :  { %6 = vsyncpa [#allocation3], 0  ;;  %s127_s0 = inlined_call_operand.hbm [shape: f32[16,128], index: 0, kind: input, shape index: {}]   ;;  %s128_s1 = inlined_call_operand.hbm [shape: f32[16,128], index: 1, kind: output, shape index: {}]  }
   0x1   :  { %7 = vsyncpa [#allocation4], 0  ;;  %s101_s6 = smov [#allocation2]  }
   0x2   :  { %s13_s7 = sshll.u32 %s101_s6, 4  ;;  %s14_s7 = int_to_ptr.vmem [resolvable:$true] %s13_s7 }
   0x3   :  { %s65_s8 = scalar_lea.vmem %s14_s7, 256  ;;  %p70_p1 = scmp.lt.s32.totalorder %s14_s7, %s14_s7 }
   0x4   :  { %p66_p0 = scmp.ne.s32.totalorder %s14_s7, %s65_s8  ;;  %p71_p2 = scmp.lt.s32.totalorder %s65_s8, %s65_s8 }
   0x6   :  { %p72_p3 = por %p71_p2, %p70_p1 }
   0x8   :  { %p73_p4 = pnand %p72_p3, %p66_p0 }
   0xa   :  { %76 = shalt.err (!%p73_p4)
}
   0xb   :  { %s102_s9 = smov 128   ;;  %s103_s10 = smov 8  }
   0xc   :  { %19 = dma.hbm_to_vmem [thread:$0]  %s127_s0, 256, %s14_s7, [#allocation3], %s102_s9, %s102_s9, %s103_s10  }
   0xd   :  { %97 = dma.done.wait [#allocation3], 256  }
   0xe   :  { %98 = vsyncadd [#allocation3], 4294967040  ;;  %v23_v0 = vld [vmem:[#allocation2] sm:$0xff]  ;;  %v24_v1 = vld [vmem:[#allocation2 + $0x8] sm:$0xff]  ;;  %s104_s13 = smov [#allocation5]  }
   0xf   :  { %v25_v2 = vadd.f32 3.0, %v23_v0  ;;  %v26_v3 = vadd.f32 3.0, %v24_v1  ;;  %s41_s14 = sshll.u32 %s104_s13, 4  ;;  %s42_s14 = int_to_ptr.vmem [resolvable:$true] %s41_s14 }
  0x10   :  { %s77_s15 = scalar_lea.vmem %s42_s14, 256  ;;  %p82_p6 = scmp.lt.s32.totalorder %s42_s14, %s42_s14 }
  0x11   :  { %v27_v4 = vmax.f32 %v25_v2, 0.0  ;;  %v28_v5 = vmax.f32 %v26_v3, 0.0  ;;  %p78_p5 = scmp.ne.s32.totalorder %s42_s14, %s77_s15  ;;  %p83_p7 = scmp.lt.s32.totalorder %s77_s15, %s77_s15 }
  0x13   :  { %v29_v6 = vmin.f32 %v27_v4, 6.0  ;;  %v30_v7 = vmin.f32 %v28_v5, 6.0  ;;  %p84_p8 = por %p83_p7, %p82_p6 }
  0x15   :  { %v32_v8 = vmul.f32 0.16666667, %v29_v6  ;;  %v33_v9 = vmul.f32 0.16666667, %v30_v7  ;;  %p85_p9 = pnand %p84_p8, %p78_p5 }
  0x17   :  { %34 = vst [vmem:[#allocation5] sm:$0xff] %v32_v8  ;;  %35 = vst [vmem:[#allocation5 + $0x8] sm:$0xff] %v33_v9 }
  0x18   :  { %88 = shalt.err (!%p85_p9)
}
  0x19   :  { %47 = dma.vmem_to_hbm [thread:$0]  %s42_s14, 256, %s128_s1, [#allocation4], %s102_s9, %s102_s9, %s103_s10  }
  0x1a   :  { %99 = dma.done.wait [#allocation4], 256  }
  0x1b   :  { %100 = vsyncadd [#allocation4], 4294967040 }
  0x1c   :  { %51 = vsyncpa [#allocation3], 1 }
  0x1d   :  { %52 = vsyncpa [#allocation4], 1 }

</bundles_post_ra>
